<compile_context>
chip_gen: v7x
topology: tpu7x:2x2x1
jax: 0.10.0
libtpu: 0.0.40
codegen_flags: <defaults>
</compile_context>

<pallas_src>
import jax
import jax.numpy as jnp
from jax.experimental import pallas as pl
from jax.experimental.pallas import tpu as pltpu

K = 5          # conv kernel width
HID = 32       # hidden channels per head
NCLS = 3       # (null, acceptor, donor)
CIN = 4        # one-hot nucleotide channels
_H2 = 2 * HID  # fused hidden width (acceptor | donor)
_Z = 8         # fused logit rows, 6 live rows padded to 8 for sublane alignment
_PAD = K // 2  # 'same' conv halo on each side


def _round_up(n, m):
    return ((n + m - 1) // m) * m


def splice_kernel(x_ref, w1_ref, b1_ref, w2_ref, b2_ref, yp_ref):
    """One (batch, length-tile) grid step.

    x_ref : (1, 1, CIN, TL + 2*_PAD) bf16  channel-major input tile with halo
    w1_ref: (K, 2*HID, CIN)          bf16  fused first-layer weights, per tap
    b1_ref: (2*HID, 1)               f32
    w2_ref: (8, 2*HID)               bf16  block-diagonal second layer (rows 6,7 = 0)
    b2_ref: (8, 1)                   f32
    yp_ref: (1, 3, TL)               f32   [null, acceptor, donor] log-probs
    """
    TL = yp_ref.shape[-1]
    xh = x_ref[0, 0]                                         # (CIN, TL + 4) bf16

    # In-kernel unfold: 5 shifted lane-slices, 5 accumulating MXU pushes.
    h = jnp.dot(w1_ref[0], xh[:, 0:TL], preferred_element_type=jnp.float32)
    for k in range(1, K):
        h = h + jnp.dot(w1_ref[k], xh[:, k:k + TL],
                        preferred_element_type=jnp.float32)

    # Fused bias + ReLU + bf16 cast (single slab, no separate f32/bf16 copies).
    hb = jnp.maximum(h + b1_ref[...], 0.0).astype(jnp.bfloat16)

    # Block-diagonal second layer, both heads: (8,64) @ (64,TL) -> (8,TL) f32.
    z = jnp.dot(w2_ref[...], hb, preferred_element_type=jnp.float32) + b2_ref[...]

    # Slab-wise log_softmax per head: sublane max/sum (XLU) + one exp per head.
    za = z[0:NCLS]                                            # acceptor logits (3, TL)
    ma = jnp.max(za, axis=0, keepdims=True)
    sa = jnp.sum(jnp.exp(za - ma), axis=0, keepdims=True)
    acc_lp = (za[1:2] - ma) - jnp.log(sa)                     # log P(class 1)

    zd = z[NCLS:2 * NCLS]                                     # donor logits (3, TL)
    md = jnp.max(zd, axis=0, keepdims=True)
    sd = jnp.sum(jnp.exp(zd - md), axis=0, keepdims=True)
    don_lp = (zd[2:3] - md) - jnp.log(sd)                     # log P(class 2)

    # null = log(1 - P_acc - P_don); clamped so two independent softmaxes whose
    # selected-class mass exceeds 1 cannot produce NaN / -inf.
    null_lp = jnp.log(jnp.maximum(1.0 - jnp.exp(acc_lp) - jnp.exp(don_lp),
                                  1e-30))

    # Direct row stores (no concatenate).
    yp_ref[0, 0:1, :] = null_lp
    yp_ref[0, 1:2, :] = acc_lp
    yp_ref[0, 2:3, :] = don_lp


def splice_forward(x, params, cl_model, *, tile_l=8192):
    """x: (B, L, 4) one-hot float32. Returns clipped yp: (B, L - cl_model, 3).

    tile_l tuning: 8192 is safe on every generation at the 32 MiB VMEM limit
    set below.  v7x / v6e can push 16384; raise vmem_limit_bytes accordingly
    if tile_l grows past ~16K (esp. on v5e whose default scoped VMEM is 16 MiB).
    """
    B, L, _ = x.shape
    w1a, b1a, w2a, b2a, w1d, b1d, w2d, b2d = params

    # ---- pack the 8 weight tensors into 4 kernel operands -------------------
    # First layer, per conv tap: (K, 2*HID, CIN), rows 0..31 acceptor, 32..63 donor.
    w1f = jnp.transpose(jnp.concatenate([w1a, w1d], axis=2), (0, 2, 1))
    w1f = w1f.astype(jnp.bfloat16)                              # (K, 64, 4)
    b1 = jnp.concatenate([b1a.reshape(HID),
                          b1d.reshape(HID)])[:, None].astype(jnp.float32)

    w2t = jnp.zeros((_Z, _H2), jnp.float32)
    w2t = w2t.at[0:NCLS, 0:HID].set(w2a.T)          # acceptor classes, rows 0..2
    w2t = w2t.at[NCLS:2 * NCLS, HID:].set(w2d.T)    # donor classes,    rows 3..5
    w2t = w2t.astype(jnp.bfloat16)
    b2 = jnp.zeros((_Z, 1), jnp.float32)
    b2 = b2.at[0:NCLS, 0].set(b2a.reshape(NCLS))
    b2 = b2.at[NCLS:2 * NCLS, 0].set(b2d.reshape(NCLS))

    # ---- channel-major bf16 tiles with a 2*_PAD halo (no im2col) -------------
    TL = min(tile_l, _round_up(L, 128))
    L_pad = _round_up(L, TL)
    n_tiles = L_pad // TL
    wtile = TL + 2 * _PAD

    x_cm = jnp.transpose(x, (0, 2, 1)).astype(jnp.bfloat16)            # (B, 4, L)
    x_cm = jnp.pad(x_cm, ((0, 0), (0, 0), (_PAD, _PAD + (L_pad - L)))) # (B, 4, L_pad+4)

    main = x_cm[:, :, :L_pad].reshape(B, CIN, n_tiles, TL)             # (B,4,NT,TL)
    halo_all = x_cm[:, :, TL:]                                         # (B,4,(NT-1)*TL+4)
    halo_all = jnp.pad(halo_all,
                       ((0, 0), (0, 0), (0, n_tiles * TL - halo_all.shape[-1])))
    halo = halo_all.reshape(B, CIN, n_tiles, TL)[..., :2 * _PAD]       # (B,4,NT,4)
    x_tiles = jnp.concatenate([main, halo], axis=-1)                   # (B,4,NT,TL+4)
    x_tiles = jnp.transpose(x_tiles, (0, 2, 1, 3))                     # (B,NT,4,TL+4)

    # ---- cost estimate (memory-bound; helps XLA overlap the layout ops) -----
    flops = 2 * B * L_pad * (K * CIN * _H2 + _H2 * _Z)
    transc = 11 * B * L_pad
    bytes_acc = (B * n_tiles * CIN * wtile * 2            # bf16 input tiles
                 + w1f.size * 2 + b1.size * 4 + w2t.size * 2 + b2.size * 4
                 + B * NCLS * L_pad * 4)                   # f32 output

    grid = (B, n_tiles)
    yp_t = pl.pallas_call(
        splice_kernel,
        out_shape=jax.ShapeDtypeStruct((B, NCLS, L_pad), jnp.float32),
        grid_spec=pltpu.PrefetchScalarGridSpec(
            num_scalar_prefetch=0,
            grid=grid,
            in_specs=[
                pl.BlockSpec((1, 1, CIN, wtile), lambda b, i: (b, i, 0, 0)),
                pl.BlockSpec(w1f.shape, lambda b, i: (0, 0, 0)),
                pl.BlockSpec(b1.shape, lambda b, i: (0, 0)),
                pl.BlockSpec(w2t.shape, lambda b, i: (0, 0)),
                pl.BlockSpec(b2.shape, lambda b, i: (0, 0)),
            ],
            out_specs=pl.BlockSpec((1, NCLS, TL), lambda b, i: (b, 0, i)),
        ),
        compiler_params=pltpu.CompilerParams(
            dimension_semantics=("parallel", "parallel"),
            vmem_limit_bytes=32 * 1024 * 1024),
        cost_estimate=pl.CostEstimate(
            flops=flops, transcendentals=transc, bytes_accessed=bytes_acc),
    )(x_tiles, w1f, b1, w2t, b2)

    # TODO(synk): the ORF post-processing in SpliceModelWithORF.forward
    # (np.where host loop over candidate sites + the external
    # `fac.all_frames_closed`) is data-dependent host logic on an undefined
    # external dependency; it is not representable as a Pallas kernel.

    # Clip first, then re-layout only the kept region to PyTorch (B, L-cl, 3).
    c = cl_model // 2
    yp = jnp.transpose(yp_t[:, :, c:L - c], (0, 2, 1))
    return yp


if __name__ == "__main__":
    key = jax.random.PRNGKey(0)
    B, L = 2, 32
    cl_model = 8

    k_x, k1, k2, k3, k4, k5, k6, k7, k8 = jax.random.split(key, 9)
    base = jax.random.randint(k_x, (B, L), 0, CIN)
    x = jax.nn.one_hot(base, CIN, dtype=jnp.float32)          # (B, L, 4)

    # Deterministic synthetic weights (acceptor model + donor model).
    w1a = 0.3 * jax.random.normal(k1, (K, CIN, HID), jnp.float32)
    b1a = 0.1 * jax.random.normal(k2, (1, HID), jnp.float32)
    w2a = 0.1 * jax.random.normal(k3, (HID, NCLS), jnp.float32)
    b2a = 0.1 * jax.random.normal(k4, (1, NCLS), jnp.float32)
    w1d = 0.3 * jax.random.normal(k5, (K, CIN, HID), jnp.float32)
    b1d = 0.1 * jax.random.normal(k6, (1, HID), jnp.float32)
    w2d = 0.1 * jax.random.normal(k7, (HID, NCLS), jnp.float32)
    b2d = 0.1 * jax.random.normal(k8, (1, NCLS), jnp.float32)
    params = (w1a, b1a, w2a, b2a, w1d, b1d, w2d, b2d)

    yp = splice_forward(x, params, cl_model)
    jax.block_until_ready(yp)

    assert yp.shape == (B, L - cl_model, NCLS), yp.shape
    assert bool(jnp.isfinite(yp).all())
    print("KERNEL_OK")
</pallas_src>

<mosaic_0001>
module attributes {stable_mosaic.version = 11 : i64} {
  func.func @splice_kernel(%arg0: i32, %arg1: i32, %arg2: memref<1x1x4x132xbf16, #tpu.memory_space<vmem>>, %arg3: memref<5x64x4xbf16, #tpu.memory_space<vmem>>, %arg4: memref<64x1xf32, #tpu.memory_space<vmem>>, %arg5: memref<8x64xbf16, #tpu.memory_space<vmem>>, %arg6: memref<8x1xf32, #tpu.memory_space<vmem>>, %arg7: memref<1x3x128xf32, #tpu.memory_space<vmem>>) attributes {dimension_semantics = [#tpu.dimension_semantics<parallel>, #tpu.dimension_semantics<parallel>], iteration_bounds = array<i64: 2, 1>, scalar_prefetch = 0 : i64, scratch_operands = 0 : i64, tpu.core_type = #tpu.core_type<tc>, window_params = [{transform_indices = @transform_0, window_bounds = array<i64: 1, 1, 4, 132>}, {pipeline_mode = #tpu.pipeline_mode<synchronous>, transform_indices = @transform_1, window_bounds = array<i64: 5, 64, 4>}, {pipeline_mode = #tpu.pipeline_mode<synchronous>, transform_indices = @transform_2, window_bounds = array<i64: 64, 1>}, {pipeline_mode = #tpu.pipeline_mode<synchronous>, transform_indices = @transform_3, window_bounds = array<i64: 8, 64>}, {pipeline_mode = #tpu.pipeline_mode<synchronous>, transform_indices = @transform_4, window_bounds = array<i64: 8, 1>}, {transform_indices = @transform_5, window_bounds = array<i64: 1, 3, 128>}]} {
    %c0 = arith.constant 0 : index
    %c0_0 = arith.constant 0 : index
    %c0_1 = arith.constant 0 : index
    %c0_2 = arith.constant 0 : index
    %0 = vector.load %arg2[%c0, %c0_0, %c0_1, %c0_2] : memref<1x1x4x132xbf16, #tpu.memory_space<vmem>>, vector<1x1x4x132xbf16>
    %1 = vector.shape_cast %0 : vector<1x1x4x132xbf16> to vector<4x132xbf16>
    %c0_3 = arith.constant 0 : index
    %c0_4 = arith.constant 0 : index
    %c0_5 = arith.constant 0 : index
    %2 = vector.load %arg3[%c0_3, %c0_4, %c0_5] : memref<5x64x4xbf16, #tpu.memory_space<vmem>>, vector<1x64x4xbf16>
    %3 = vector.shape_cast %2 : vector<1x64x4xbf16> to vector<64x4xbf16>
    %4 = vector.extract_strided_slice %1 {offsets = [0, 0], sizes = [4, 128], strides = [1, 1]} : vector<4x132xbf16> to vector<4x128xbf16>
    %cst = arith.constant dense<0.000000e+00> : vector<64x128xf32>
    %5 = tpu.matmul %3, %4, %cst {dimension_numbers = #tpu.dot_dimension_numbers<[1], [0], [0], [1], [0, 0, 1, 1], [], []>} : vector<64x4xbf16>, vector<4x128xbf16>, vector<64x128xf32> -> vector<64x128xf32>
    %c1 = arith.constant 1 : index
    %c0_6 = arith.constant 0 : index
    %c0_7 = arith.constant 0 : index
    %6 = vector.load %arg3[%c1, %c0_6, %c0_7] : memref<5x64x4xbf16, #tpu.memory_space<vmem>>, vector<1x64x4xbf16>
    %7 = vector.shape_cast %6 : vector<1x64x4xbf16> to vector<64x4xbf16>
    %8 = vector.extract_strided_slice %1 {offsets = [0, 1], sizes = [4, 128], strides = [1, 1]} : vector<4x132xbf16> to vector<4x128xbf16>
    %cst_8 = arith.constant dense<0.000000e+00> : vector<64x128xf32>
    %9 = tpu.matmul %7, %8, %cst_8 {dimension_numbers = #tpu.dot_dimension_numbers<[1], [0], [0], [1], [0, 0, 1, 1], [], []>} : vector<64x4xbf16>, vector<4x128xbf16>, vector<64x128xf32> -> vector<64x128xf32>
    %10 = arith.addf %5, %9 : vector<64x128xf32>
    %c2 = arith.constant 2 : index
    %c0_9 = arith.constant 0 : index
    %c0_10 = arith.constant 0 : index
    %11 = vector.load %arg3[%c2, %c0_9, %c0_10] : memref<5x64x4xbf16, #tpu.memory_space<vmem>>, vector<1x64x4xbf16>
    %12 = vector.shape_cast %11 : vector<1x64x4xbf16> to vector<64x4xbf16>
    %13 = vector.extract_strided_slice %1 {offsets = [0, 2], sizes = [4, 128], strides = [1, 1]} : vector<4x132xbf16> to vector<4x128xbf16>
    %cst_11 = arith.constant dense<0.000000e+00> : vector<64x128xf32>
    %14 = tpu.matmul %12, %13, %cst_11 {dimension_numbers = #tpu.dot_dimension_numbers<[1], [0], [0], [1], [0, 0, 1, 1], [], []>} : vector<64x4xbf16>, vector<4x128xbf16>, vector<64x128xf32> -> vector<64x128xf32>
    %15 = arith.addf %10, %14 : vector<64x128xf32>
    %c3 = arith.constant 3 : index
    %c0_12 = arith.constant 0 : index
    %c0_13 = arith.constant 0 : index
    %16 = vector.load %arg3[%c3, %c0_12, %c0_13] : memref<5x64x4xbf16, #tpu.memory_space<vmem>>, vector<1x64x4xbf16>
    %17 = vector.shape_cast %16 : vector<1x64x4xbf16> to vector<64x4xbf16>
    %18 = vector.extract_strided_slice %1 {offsets = [0, 3], sizes = [4, 128], strides = [1, 1]} : vector<4x132xbf16> to vector<4x128xbf16>
    %cst_14 = arith.constant dense<0.000000e+00> : vector<64x128xf32>
    %19 = tpu.matmul %17, %18, %cst_14 {dimension_numbers = #tpu.dot_dimension_numbers<[1], [0], [0], [1], [0, 0, 1, 1], [], []>} : vector<64x4xbf16>, vector<4x128xbf16>, vector<64x128xf32> -> vector<64x128xf32>
    %20 = arith.addf %15, %19 : vector<64x128xf32>
    %c4 = arith.constant 4 : index
    %c0_15 = arith.constant 0 : index
    %c0_16 = arith.constant 0 : index
    %21 = vector.load %arg3[%c4, %c0_15, %c0_16] : memref<5x64x4xbf16, #tpu.memory_space<vmem>>, vector<1x64x4xbf16>
    %22 = vector.shape_cast %21 : vector<1x64x4xbf16> to vector<64x4xbf16>
    %23 = vector.extract_strided_slice %1 {offsets = [0, 4], sizes = [4, 128], strides = [1, 1]} : vector<4x132xbf16> to vector<4x128xbf16>
    %cst_17 = arith.constant dense<0.000000e+00> : vector<64x128xf32>
    %24 = tpu.matmul %22, %23, %cst_17 {dimension_numbers = #tpu.dot_dimension_numbers<[1], [0], [0], [1], [0, 0, 1, 1], [], []>} : vector<64x4xbf16>, vector<4x128xbf16>, vector<64x128xf32> -> vector<64x128xf32>
    %25 = arith.addf %20, %24 : vector<64x128xf32>
    %c0_18 = arith.constant 0 : index
    %c0_19 = arith.constant 0 : index
    %26 = vector.load %arg4[%c0_18, %c0_19] : memref<64x1xf32, #tpu.memory_space<vmem>>, vector<64x1xf32>
    %27 = vector.broadcast %26 : vector<64x1xf32> to vector<64x128xf32>
    %28 = arith.addf %25, %27 : vector<64x128xf32>
    %cst_20 = arith.constant 0.000000e+00 : f32
    %29 = vector.broadcast %cst_20 : f32 to vector<64x128xf32>
    %30 = arith.maximumf %28, %29 : vector<64x128xf32>
    %31 = arith.truncf %30 : vector<64x128xf32> to vector<64x128xbf16>
    %c0_21 = arith.constant 0 : index
    %c0_22 = arith.constant 0 : index
    %32 = vector.load %arg5[%c0_21, %c0_22] : memref<8x64xbf16, #tpu.memory_space<vmem>>, vector<8x64xbf16>
    %cst_23 = arith.constant dense<0.000000e+00> : vector<8x128xf32>
    %33 = tpu.matmul %32, %31, %cst_23 {dimension_numbers = #tpu.dot_dimension_numbers<[1], [0], [0], [1], [0, 0, 1, 1], [], []>} : vector<8x64xbf16>, vector<64x128xbf16>, vector<8x128xf32> -> vector<8x128xf32>
    %c0_24 = arith.constant 0 : index
    %c0_25 = arith.constant 0 : index
    %34 = vector.load %arg6[%c0_24, %c0_25] : memref<8x1xf32, #tpu.memory_space<vmem>>, vector<8x1xf32>
    %35 = vector.broadcast %34 : vector<8x1xf32> to vector<8x128xf32>
    %36 = arith.addf %33, %35 : vector<8x128xf32>
    %37 = vector.extract_strided_slice %36 {offsets = [0, 0], sizes = [3, 128], strides = [1, 1]} : vector<8x128xf32> to vector<3x128xf32>
    %cst_26 = arith.constant dense<0xFF800000> : vector<128xf32>
    %38 = vector.multi_reduction <maximumf>, %37, %cst_26 [0] : vector<3x128xf32> to vector<128xf32>
    %39 = vector.shape_cast %38 : vector<128xf32> to vector<1x128xf32>
    %40 = vector.broadcast %39 : vector<1x128xf32> to vector<3x128xf32>
    %41 = arith.subf %37, %40 : vector<3x128xf32>
    %42 = math.exp %41 : vector<3x128xf32>
    %cst_27 = arith.constant dense<0.000000e+00> : vector<128xf32>
    %43 = vector.multi_reduction <add>, %42, %cst_27 [0] : vector<3x128xf32> to vector<128xf32>
    %44 = vector.shape_cast %43 : vector<128xf32> to vector<1x128xf32>
    %45 = vector.extract_strided_slice %37 {offsets = [1, 0], sizes = [1, 128], strides = [1, 1]} : vector<3x128xf32> to vector<1x128xf32>
    %46 = arith.subf %45, %39 : vector<1x128xf32>
    %47 = math.log %44 : vector<1x128xf32>
    %48 = arith.subf %46, %47 : vector<1x128xf32>
    %49 = vector.extract_strided_slice %36 {offsets = [3, 0], sizes = [3, 128], strides = [1, 1]} : vector<8x128xf32> to vector<3x128xf32>
    %cst_28 = arith.constant dense<0xFF800000> : vector<128xf32>
    %50 = vector.multi_reduction <maximumf>, %49, %cst_28 [0] : vector<3x128xf32> to vector<128xf32>
    %51 = vector.shape_cast %50 : vector<128xf32> to vector<1x128xf32>
    %52 = vector.broadcast %51 : vector<1x128xf32> to vector<3x128xf32>
    %53 = arith.subf %49, %52 : vector<3x128xf32>
    %54 = math.exp %53 : vector<3x128xf32>
    %cst_29 = arith.constant dense<0.000000e+00> : vector<128xf32>
    %55 = vector.multi_reduction <add>, %54, %cst_29 [0] : vector<3x128xf32> to vector<128xf32>
    %56 = vector.shape_cast %55 : vector<128xf32> to vector<1x128xf32>
    %57 = vector.extract_strided_slice %49 {offsets = [2, 0], sizes = [1, 128], strides = [1, 1]} : vector<3x128xf32> to vector<1x128xf32>
    %58 = arith.subf %57, %51 : vector<1x128xf32>
    %59 = math.log %56 : vector<1x128xf32>
    %60 = arith.subf %58, %59 : vector<1x128xf32>
    %61 = math.exp %48 : vector<1x128xf32>
    %cst_30 = arith.constant 1.000000e+00 : f32
    %62 = vector.broadcast %cst_30 : f32 to vector<1x128xf32>
    %63 = arith.subf %62, %61 : vector<1x128xf32>
    %64 = math.exp %60 : vector<1x128xf32>
    %65 = arith.subf %63, %64 : vector<1x128xf32>
    %cst_31 = arith.constant 1.000000e-30 : f32
    %66 = vector.broadcast %cst_31 : f32 to vector<1x128xf32>
    %67 = arith.maximumf %65, %66 : vector<1x128xf32>
    %68 = math.log %67 : vector<1x128xf32>
    %c0_32 = arith.constant 0 : index
    %c0_33 = arith.constant 0 : index
    %c0_34 = arith.constant 0 : index
    %69 = vector.load %arg7[%c0_32, %c0_33, %c0_34] : memref<1x3x128xf32, #tpu.memory_space<vmem>>, vector<1x1x128xf32>
    %70 = vector.shape_cast %69 : vector<1x1x128xf32> to vector<1x128xf32>
    %71 = vector.shape_cast %68 : vector<1x128xf32> to vector<1x1x128xf32>
    tpu.vector_store %arg7[%c0_32, %c0_33, %c0_34], %71 {strides = array<i32>} : memref<1x3x128xf32, #tpu.memory_space<vmem>>, vector<1x1x128xf32>,
    %c0_35 = arith.constant 0 : index
    %c1_36 = arith.constant 1 : index
    %c0_37 = arith.constant 0 : index
    %72 = vector.load %arg7[%c0_35, %c1_36, %c0_37] : memref<1x3x128xf32, #tpu.memory_space<vmem>>, vector<1x1x128xf32>
    %73 = vector.shape_cast %72 : vector<1x1x128xf32> to vector<1x128xf32>
    %74 = vector.shape_cast %48 : vector<1x128xf32> to vector<1x1x128xf32>
    tpu.vector_store %arg7[%c0_35, %c1_36, %c0_37], %74 {strides = array<i32>} : memref<1x3x128xf32, #tpu.memory_space<vmem>>, vector<1x1x128xf32>,
    %c0_38 = arith.constant 0 : index
    %c2_39 = arith.constant 2 : index
    %c0_40 = arith.constant 0 : index
    %75 = vector.load %arg7[%c0_38, %c2_39, %c0_40] : memref<1x3x128xf32, #tpu.memory_space<vmem>>, vector<1x1x128xf32>
    %76 = vector.shape_cast %75 : vector<1x1x128xf32> to vector<1x128xf32>
    %77 = vector.shape_cast %60 : vector<1x128xf32> to vector<1x1x128xf32>
    tpu.vector_store %arg7[%c0_38, %c2_39, %c0_40], %77 {strides = array<i32>} : memref<1x3x128xf32, #tpu.memory_space<vmem>>, vector<1x1x128xf32>,
    return
  }
  func.func @transform_0(%arg0: i32, %arg1: i32) -> (i32, i32, i32, i32) {
    %c0_i32 = arith.constant 0 : i32
    %c0_i32_0 = arith.constant 0 : i32
    %c0_i32_1 = arith.constant 0 : i32
    return %arg0, %arg1, %c0_i32, %c0_i32_0 : i32, i32, i32, i32
  }
  func.func @transform_1(%arg0: i32, %arg1: i32) -> (i32, i32, i32) {
    %c0_i32 = arith.constant 0 : i32
    %c0_i32_0 = arith.constant 0 : i32
    %c0_i32_1 = arith.constant 0 : i32
    %c0_i32_2 = arith.constant 0 : i32
    return %c0_i32, %c0_i32_0, %c0_i32_1 : i32, i32, i32
  }
  func.func @transform_2(%arg0: i32, %arg1: i32) -> (i32, i32) {
    %c0_i32 = arith.constant 0 : i32
    %c0_i32_0 = arith.constant 0 : i32
    %c0_i32_1 = arith.constant 0 : i32
    return %c0_i32, %c0_i32_0 : i32, i32
  }
  func.func @transform_3(%arg0: i32, %arg1: i32) -> (i32, i32) {
    %c0_i32 = arith.constant 0 : i32
    %c0_i32_0 = arith.constant 0 : i32
    %c0_i32_1 = arith.constant 0 : i32
    return %c0_i32, %c0_i32_0 : i32, i32
  }
  func.func @transform_4(%arg0: i32, %arg1: i32) -> (i32, i32) {
    %c0_i32 = arith.constant 0 : i32
    %c0_i32_0 = arith.constant 0 : i32
    %c0_i32_1 = arith.constant 0 : i32
    return %c0_i32, %c0_i32_0 : i32, i32
  }
  func.func @transform_5(%arg0: i32, %arg1: i32) -> (i32, i32, i32) {
    %c0_i32 = arith.constant 0 : i32
    %c0_i32_0 = arith.constant 0 : i32
    return %arg0, %c0_i32, %arg1 : i32, i32, i32
  }
}

</mosaic_0001>

<bundles_post_ra>
// kernel: tpu_custom_call.1
= control target key start
LH: loop header
LB: loop body
LE: loop exit
PB: predicated region body
PF: predicated region fallthrough
CT: control target
= control target key end

     0   :  { %s1464_s18 = smov 0   ;;  %s1466_s19 = smov 0   ;;  %s1632_s0 = inlined_call_operand.vmem [shape: bf16[2,1,4,132], index: 0, kind: input, shape index: {}]   ;;  %s1633_s1 = inlined_call_operand.vmem [shape: bf16[5,64,4], index: 1, kind: input, shape index: {}]   ;;  %s1634_s2 = inlined_call_operand.vmem [shape: f32[64,1], index: 2, kind: input, shape index: {}]   ;;  %s1635_s3 = inlined_call_operand.vmem [shape: bf16[8,64], index: 3, kind: input, shape index: {}]   ;;  %s1636_s4 = inlined_call_operand.vmem [shape: f32[8,1], index: 4, kind: input, shape index: {}]   ;;  %s1637_s5 = inlined_call_operand.vmem [shape: f32[2,3,128], index: 5, kind: output, shape index: {}]  }
   0x1   :  { %s1468_s20 = smov 0  }
   0x2 LB: > { %s27_s21 = sadd.s32 1, %s1420_s19  ;;  %p1125_p0 = scmp.ge.s32.totalorder %s1424_s20, 1  ;;  %s1424_s20 = sphi %s1468_s20, %s15_s20   ;;  %s1420_s19 = sphi %s1466_s19, %s1639_s19   ;;  %s1416_s18 = sphi %s1464_s18, %s1638_s18  }
   0x3   : > { %p29_p1 = scmp.ge.s32.totalorder %s27_s21, 2  ;;  %p207_p2 = scmp.lt.s32.totalorder %s1424_s20, 3 }
   0x5   : > { %s1641_s21 = smov (%p29_p1, %s27_s21), 0  ;;  %p208_p3 = pnand %p1125_p0, %p207_p2 }
   0x6   : > { %p241_p4 = scmp.lt.s32.totalorder (!%p208_p3), %s1416_s18, 1  ;;  %v300_v0 = vlaneseq (!%p208_p3)  ;;  %v1426_v1 = vmov (!%p208_p3), 1983009808   ;;  %v1368_v4 = vld [vmem:[%s1633_s1 + $0x20] sm:$0xff] (!%p208_p3)   ;;  %vm311_vm0 = vcmask (!%p208_p3), 31744   ;;  %s1427_s30 = smov (!%p208_p3), 127  }
   0x7   : > { %211 = sbr.rel (%p208_p3) target bundleno = 720 (0x2d0), region = 40  ;;  %v298_v2 = vunpack.c.l.s4 (!%p208_p3), %v1426_v1  ;;  %v1369_v5 = vld [vmem:[%s1633_s1 + $0x40] sm:$0xff] (!%p208_p3)   ;;  %1237 = vmatprep.mubr.msk.bf16.mxu1 (!%p208_p3), %vm311_vm0, %v1368_v4  ;;  %s1428_s6 = smov (!%p208_p3), 126   ;;  %v863_v11 = vld [vmem:[%s1634_s2 + $0x8] sm:$0xff] (!%p208_p3)  ;;  %v1431_v13 = vmov (!%p208_p3), 0   ;;  %v864_v14 = vld [vmem:[%s1634_s2 + $0x10] sm:$0xff] (!%p208_p3) }
   0x8   : > { %v301_v3 = vshrl.u32 (!%p208_p3), %v300_v0, 7  ;;  %1257 = vmatprep.mubr.msk.bf16.mxu0 (!%p208_p3), %vm311_vm0, %v1369_v5  ;;  %s1429_s7 = smov (!%p208_p3), 125   ;;  %s1430_s8 = smov (!%p208_p3), 124   ;;  %v862_v12 = vld [vmem:[%s1634_s2] sm:$0xff] (!%p208_p3)  ;;  %1367 = vset.pattern.permute.xlu1 (!%p208_p3), %v1431_v13  ;;  %v865_v15 = vld [vmem:[%s1634_s2 + $0x18] sm:$0xff] (!%p208_p3)  ;;  %v867_v17 = vld [vmem:[%s1634_s2 + $0x28] sm:$0xff] (!%p208_p3) }
   0x9   : > { %v299_v6 = vunpack.c.0.s8 (!%p208_p3), %v298_v2  ;;  %1366 = vset.pattern.permute.xlu0 (!%p208_p3), %v1431_v13  ;;  %v866_v16 = vld [vmem:[%s1634_s2 + $0x20] sm:$0xff] (!%p208_p3)  ;;  %v868_v18 = vld [vmem:[%s1634_s2 + $0x30] sm:$0xff] (!%p208_p3)  ;;  %v869_v19 = vld [vmem:[%s1634_s2 + $0x38] sm:$0xff] (!%p208_p3)  ;;  %vm309_vm1 = vcmask (!%p208_p3), 1039360   ;;  %vm526_vm2 = vcmask (!%p208_p3), 1031168   ;;  %vm324_vm3 = vcmask (!%p208_p3), 1041408  }
   0xa   : > { %v931_v20 = vld [vmem:[%s1636_s4] sm:$0xff] (!%p208_p3)  ;;  %vm649_vm4 = vcmask (!%p208_p3), 1022976   ;;  %v1370_v29 = vld [vmem:[%s1633_s1 + $0x28] sm:$0xff] (!%p208_p3)   ;;  %v1372_v31 = vld [vmem:[%s1633_s1 + $0x30] sm:$0xff] (!%p208_p3)   ;;  %vm772_vm5 = vcmask (!%p208_p3), 1014784   ;;  %v1432_v56 = vmov (!%p208_p3), 0.0  }
   0xb   : > { %v302_v7 = vsub.s32 (!%p208_p3), %v299_v6, %v301_v3  ;;  %v1371_v30 = vld [vmem:[%s1633_s1 + $0x48] sm:$0xff] (!%p208_p3)   ;;  %v1373_v34 = vld [vmem:[%s1633_s1 + $0x50] sm:$0xff] (!%p208_p3)   ;;  %v1374_v41 = vld [vmem:[%s1633_s1 + $0x38] sm:$0xff] (!%p208_p3)   ;;  %vm1433_vm6 = vmmov (!%p208_p3), 0   ;;  %vm937_vm7 = vcmask (!%p208_p3), 523264   ;;  %vm981_vm8 = vcmask (!%p208_p3), 1042432  }
   0xc   : > { %v1375_v42 = vld [vmem:[%s1633_s1 + $0x58] sm:$0xff] (!%p208_p3)   ;;  %v1376_v43 = vld [vmem:[%s1633_s1] sm:$0xff] (!%p208_p3)   ;;  %v1378_v45 = vld [vmem:[%s1633_s1 + $0x8] sm:$0xff] (!%p208_p3)   ;;  %vm1002_vm9 = vcmask (!%p208_p3), 1045507  }
   0xd   : > { %v1377_v44 = vld [vmem:[%s1633_s1 + $0x60] sm:$0xff] (!%p208_p3)   ;;  %v1379_v46 = vld [vmem:[%s1633_s1 + $0x68] sm:$0xff] (!%p208_p3)   ;;  %v1380_v47 = vld [vmem:[%s1633_s1 + $0x10] sm:$0xff] (!%p208_p3)  }
   0xe   : > { %s1643_s18 = smov (!%p241_p4, %s1416_s18), 1  ;;  %v1381_v49 = vld [vmem:[%s1633_s1 + $0x70] sm:$0xff]   ;;  %v1382_v50 = vld [vmem:[%s1633_s1 + $0x18] sm:$0xff]   ;;  %v1384_v52 = vld [vmem:[%s1633_s1 + $0x80] sm:$0xff]  }
   0xf   : > { %s1204_s26 = sshll.u32 %s1643_s18, 2  ;;  %v1383_v51 = vld [vmem:[%s1633_s1 + $0x78] sm:$0xff]   ;;  %v1385_v53 = vld [vmem:[%s1633_s1 + $0x88] sm:$0xff]   ;;  %v1386_v54 = vld [vmem:[%s1633_s1 + $0x90] sm:$0xff]  }
  0x10   : > { %s249_s29 = scalar_lea.vmem %s1632_s0, %s1204_s26  ;;  %v1387_v55 = vld [vmem:[%s1633_s1 + $0x98] sm:$0xff]  }
  0x11   : > { %v1498_v8 = vld [vmem:[%s249_s29] sm:$0xf] }
  0x12   : > { %v303_v9 = vrot.slane %v1498_v8, %v302_v7  ;;  %v426_v37 = vsel %vm324_vm3, %v1498_v8, 0 }
  0x14   : > { %305 = vrot.lane.b32.xlu1 %v303_v9, %s1427_s30  ;;  %522 = vrot.lane.b32.xlu0 %v303_v9, %s1428_s6  ;;  %v304_v10 = vcombine.high %v303_v9, %v303_v9 }
  0x18   : > { %307 = vrot.lane.b32.xlu1 %v304_v10, %s1427_s30  ;;  %524 = vrot.lane.b32.xlu0 %v304_v10, %s1428_s6 }
  0x1c   : > { %647 = vrot.lane.b32.xlu1 %v304_v10, %s1429_s7  ;;  %645 = vrot.lane.b32.xlu0 %v303_v9, %s1429_s7  ;;  %s256_s7 = scalar_lea.vmem %s1637_s5, %s1204_s26 }
  0x20   : > { %770 = vrot.lane.b32.xlu1 %v304_v10, %s1430_s8  ;;  %768 = vrot.lane.b32.xlu0 %v303_v9, %s1430_s8 }
  0x24   : > { %877 = vperm.xlu1 %1367, %v863_v11   ;;  %872 = vperm.xlu0 %1366, %v862_v12  }
  0x28   : > { %882 = vperm.xlu1 %1367, %v864_v14   ;;  %887 = vperm.xlu0 %1366, %v865_v15  }
  0x2c   : > { %892 = vperm.xlu1 %1367, %v866_v16   ;;  %897 = vperm.xlu0 %1366, %v867_v17  }
  0x30   : > { %902 = vperm.xlu1 %1367, %v868_v18   ;;  %907 = vperm.xlu0 %1366, %v869_v19  }
  0x34   : > { %934 = vperm.xlu1 %1367, %v931_v20  }
  0x86   : > { %v306_v21 = vpop.permute.xlu1 %305  ;;  %v523_v22 = vpop.permute.xlu0 %522 }
  0x8a   : > { %v308_v23 = vpop.permute.xlu1 %307  ;;  %v525_v24 = vpop.permute.xlu0 %524 }
  0x8b   : > { %v310_v25 = vsel %vm309_vm1, %v306_v21, %v308_v23  ;;  %v527_v26 = vsel %vm526_vm2, %v523_v22, %v525_v24 }
  0x8c   : > { %1329 = vmatprep.subr.msk.bf16.mxu1 %vm324_vm3, %v310_v25  ;;  %1331 = vmatprep.subr.msk.bf16.mxu0 %vm324_vm3, %v527_v26  ;;  %v326_v27 = vsel %vm324_vm3, %v310_v25, 0  ;;  %v541_v28 = vsel %vm324_vm3, %v527_v26, 0 }
  0x8d   : > { %1236 = vmatpush3.bf16.msra.mxu1 %v326_v27  ;;  %1256 = vmatpush3.bf16.msra.mxu0 %v541_v28 }
  0x8e   : > { %v648_v32 = vpop.permute.xlu1 %647  ;;  %v646_v33 = vpop.permute.xlu0 %645  ;;  %1330 = vmatprep.subr.msk.bf16.mxu1 %vm324_vm3, %v1498_v8 }
  0x8f   : > { %v650_v35 = vsel %vm649_vm4, %v646_v33, %v648_v32 }
  0x90   : > { %v664_v36 = vsel %vm324_vm3, %v650_v35, 0  ;;  %1238 = vmatmul.mubr.msk.bf16.vlgmr.msra.gmra.mrb[0].mxu1 %vm311_vm0, %v1370_v29  ;;  %1258 = vmatmul.mubr.msk.bf16.vlgmr.msra.gmra.mrb[0].mxu0 %vm311_vm0, %v1371_v30 }
  0x91   : > { %1332 = vmatprep.subr.msk.bf16.mxu0 %vm324_vm3, %v650_v35  ;;  %1241 = vmatprep.mubr.msk.bf16.mxu1 %vm311_vm0, %v1372_v31 }
  0x92   : > { %1266 = vmatpush3.bf16.msra.mxu0 %v664_v36  ;;  %1261 = vmatprep.mubr.msk.bf16.mxu0 %vm311_vm0, %v1373_v34  ;;  %v771_v38 = vpop.permute.xlu1 %770  ;;  %v769_v39 = vpop.permute.xlu0 %768 }
  0x93   : > { %1246 = vmatpush3.bf16.msra.mxu1 %v426_v37  ;;  %v773_v40 = vsel %vm772_vm5, %v769_v39, %v771_v38 }
  0x94   : > { %1333 = vmatprep.subr.msk.bf16.mxu0 %vm324_vm3, %v773_v40  ;;  %v787_v48 = vsel %vm324_vm3, %v773_v40, 0  ;;  %1285 = vmatprep.subr.bf16.mxu1 %v1432_v56 }
  0x98   : > { %1242 = vmatmul.mubr.msk.bf16.gmra.mrb[4].mxu1 %vm311_vm0, %v1374_v41  ;;  %1262 = vmatmul.mubr.msk.bf16.gmra.mrb[4].mxu0 %vm311_vm0, %v1375_v42 }
  0x99   : > { %1247 = vmatprep.mubr.msk.bf16.mxu1 %vm311_vm0, %v1376_v43  ;;  %1267 = vmatprep.mubr.msk.bf16.mxu0 %vm311_vm0, %v1377_v44 }
  0xa0   : > { %1248 = vmatmul.mubr.msk.bf16.vlgmr.msra.gmra.mrb[0].mxu1 %vm311_vm0, %v1378_v45  ;;  %1268 = vmatmul.mubr.msk.bf16.vlgmr.msra.gmra.mrb[0].mxu0 %vm311_vm0, %v1379_v46  ;;  %v930_v45 = vld [vmem:[%s1635_s3] sm:$0xf] }
  0xa1   : > { %1276 = vmatpush3.bf16.msra.mxu0 %v787_v48  ;;  %1251 = vmatprep.mubr.msk.bf16.mxu1 %vm311_vm0, %v1380_v47 }
  0xa2   : > { %1271 = vmatprep.mubr.msk.bf16.mxu0 %vm311_vm0, %v1381_v49 }
  0xa3   : > { %v878_v61 = vpop.permute.xlu1 %877  ;;  %v873_v0 = vpop.permute.xlu0 %872 }
  0xa7   : > { %v883_v3 = vpop.permute.xlu1 %882  ;;  %v888_v4 = vpop.permute.xlu0 %887 }
  0xa8   : > { %1252 = vmatmul.mubr.msk.bf16.gmra.mrb[4].mxu1 %vm311_vm0, %v1382_v50  ;;  %1272 = vmatmul.mubr.msk.bf16.gmra.mrb[4].mxu0 %vm311_vm0, %v1383_v51 }
  0xa9   : > { %1277 = vmatprep.mubr.msk.bf16.mxu0 %vm311_vm0, %v1384_v52  ;;  %1293 = vmatprep.mubr.msk.bf16.mxu1 %vm1433_vm6, %v1432_v56 }
  0xab   : > { %v893_v13 = vpop.permute.xlu1 %892  ;;  %v898_v17 = vpop.permute.xlu0 %897 }
  0xaf   : > { %v903_v27 = vpop.permute.xlu1 %902  ;;  %v908_v34 = vpop.permute.xlu0 %907 }
  0xb0   : > { %1278 = vmatmul.mubr.msk.bf16.vlgmr.msra.gmra.mrb[0].mxu0 %vm311_vm0, %v1385_v53 }
  0xb1   : > { %1281 = vmatprep.mubr.msk.bf16.mxu0 %vm311_vm0, %v1386_v54 }
  0xb3   : > { %v935_v46 = vpop.permute.xlu1 %934 }
  0xb8   : > { %1282 = vmatmul.mubr.msk.bf16.gmra.mrb[4].mxu0 %vm311_vm0, %v1387_v55 }
 0x173   : > { %v1249_v57 = vpop.f32.mrb[0].mxu1 }
 0x174   : > { %v462_v58 = vpop.f32.mrb[1].mxu1 }
 0x175   : > { %v1250_v59 = vpop.f32.mrb[2].mxu1 }
 0x176   : > { %v465_v60 = vpop.f32.mrb[3].mxu1 }
 0x17b   : > { %v1253_v62 = vpop.f32.mrb[4].mxu1 }
 0x17c   : > { %v478_v63 = vpop.f32.mrb[5].mxu1 }
 0x17d   : > { %v1254_v1 = vpop.f32.mrb[6].mxu1 }
 0x17e   : > { %v481_v2 = vpop.f32.mrb[7].mxu1 }
 0x183   : > { %v1279_v5 = vpop.f32.mrb[0].mxu0 }
 0x184   : > { %v1297_v6 = vadd.f32 %v1279_v5, %v1249_v57  ;;  %v823_v7 = vpop.f32.mrb[1].mxu0 }
 0x185   : > { %v1298_v8 = vadd.f32 %v823_v7, %v462_v58  ;;  %v1280_v9 = vpop.f32.mrb[2].mxu0 }
 0x186   : > { %v912_v10 = vadd.f32 %v1297_v6, %v883_v3  ;;  %v1299_v11 = vadd.f32 %v1280_v9, %v1250_v59  ;;  %v826_v12 = vpop.f32.mrb[3].mxu0 }
 0x187   : > { %v910_v14 = vadd.f32 %v1298_v8, %v873_v0  ;;  %v1300_v15 = vadd.f32 %v826_v12, %v465_v60 }
 0x188   : > { %v913_v16 = vadd.f32 %v1299_v11, %v888_v4  ;;  %v920_v19 = vmax.f32 %v912_v10, 0.0 }
 0x189   : > { %v911_v18 = vadd.f32 %v1300_v15, %v878_v61  ;;  %v918_v21 = vmax.f32 %v910_v14, 0.0 }
 0x18a   : > { %v921_v20 = vmax.f32 %v913_v16, 0.0 }
 0x18b   : > { %v919_v22 = vmax.f32 %v911_v18, 0.0  ;;  %v1283_v23 = vpop.f32.mrb[4].mxu0 }
 0x18c   : > { %v927_v24 = vpack.c.bf16 %v921_v20, %v920_v19  ;;  %v1301_v25 = vadd.f32 %v1283_v23, %v1253_v62  ;;  %v839_v26 = vpop.f32.mrb[5].mxu0 }
 0x18d   : > { %v926_v28 = vpack.c.bf16 %v919_v22, %v918_v21  ;;  %v1302_v29 = vadd.f32 %v839_v26, %v478_v63  ;;  %v1284_v30 = vpop.f32.mrb[6].mxu0 }
 0x18e   : > { %v916_v31 = vadd.f32 %v1301_v25, %v903_v27  ;;  %v1303_v32 = vadd.f32 %v1284_v30, %v1254_v1  ;;  %v842_v33 = vpop.f32.mrb[7].mxu0 }
 0x18f   : > { %v914_v35 = vadd.f32 %v1302_v29, %v893_v13  ;;  %v1304_v36 = vadd.f32 %v842_v33, %v481_v2  ;;  %1286 = vmatpush3.bf16.msra.mxu1 %v926_v28 }
 0x190   : > { %v917_v37 = vadd.f32 %v1303_v32, %v908_v34  ;;  %1287 = vmatprep.subr.bf16.mxu1 %v1432_v56  ;;  %v924_v39 = vmax.f32 %v916_v31, 0.0 }
 0x191   : > { %v915_v38 = vadd.f32 %v1304_v36, %v898_v17  ;;  %v922_v41 = vmax.f32 %v914_v35, 0.0 }
 0x192   : > { %v925_v40 = vmax.f32 %v917_v37, 0.0 }
 0x193   : > { %v923_v42 = vmax.f32 %v915_v38, 0.0  ;;  %1288 = vmatpush3.bf16.msra.mxu1 %v927_v24 }
 0x194   : > { %v929_v43 = vpack.c.bf16 %v925_v40, %v924_v39  ;;  %1289 = vmatprep.subr.bf16.mxu1 %v1432_v56 }
 0x195   : > { %v928_v44 = vpack.c.bf16 %v923_v42, %v922_v41 }
 0x197   : > { %1290 = vmatpush3.bf16.msra.mxu1 %v928_v44 }
 0x198   : > { %1291 = vmatprep.subr.bf16.mxu1 %v1432_v56 }
 0x19b   : > { %1292 = vmatpush3.bf16.msra.mxu1 %v929_v43 }
 0x19e   : > { %1294 = vmatmul.mubr.msk.bf16.vlgmr.msra.gmra.mrb[8].mxu1 %vm937_vm7, %v930_v45 }
 0x271   : > { %v975_v47 = vpop.f32.mrb[8].mxu1 }
 0x272   : > { %v976_v48 = vadd.f32 %v975_v47, %v935_v46  ;;  %v1295_v49 = vpop.f32.mrb[9].mxu1 }
 0x273   : > { %v978_v50 = vpop.f32.mrb[10].mxu1 }
 0x274   : > { %v982_v51 = vsel %vm981_vm8, %v976_v48, -inf  ;;  %v1003_v52 = vsel %vm1002_vm9, %v976_v48, -inf  ;;  %v1296_v53 = vpop.f32.mrb[11].mxu1 }
 0x275   : > { %v983_v54 = vrot.slane %v982_v51, 4  ;;  %v1004_v55 = vrot.slane %v1003_v52, 4 }
 0x277   : > { %v984_v56 = vmax.f32 %v982_v51, %v983_v54  ;;  %v1005_v57 = vmax.f32 %v1003_v52, %v1004_v55 }
 0x279   : > { %v985_v58 = vrot.slane %v984_v56, 2  ;;  %v1006_v59 = vrot.slane %v1005_v57, 2 }
 0x27b   : > { %v986_v60 = vmax.f32 %v984_v56, %v985_v58  ;;  %v1007_v61 = vmax.f32 %v1005_v57, %v1006_v59 }
 0x27d   : > { %v987_v62 = vrot.slane %v986_v60, 1  ;;  %v1008_v63 = vrot.slane %v1007_v61, 1 }
 0x27f   : > { %v988_v0 = vmax.f32 %v986_v60, %v987_v62  ;;  %v1009_v1 = vmax.f32 %v1007_v61, %v1008_v63 }
 0x281   : > { %v989_v2 = vsub.f32 %v976_v48, %v988_v0  ;;  %v1010_v3 = vsub.f32 %v976_v48, %v1009_v1 }
 0x283   : > { %v990_v4 = vmul.f32 1.442695, %v989_v2  ;;  %v1011_v5 = vmul.f32 1.442695, %v1010_v3 }
 0x285   : > { %1388 = vpow2.f32 %v990_v4 }
 0x286   : > { %1390 = vpow2.f32 %v1011_v5 }
 0x28f   : > { %v1389_v6 = vpop.eup %1388 }
 0x290   : > { %v1391_v7 = vpop.eup %1390  ;;  %v992_v8 = vsel %vm981_vm8, %v1389_v6, 0.0 }
 0x291   : > { %v993_v9 = vrot.slane %v992_v8, 4  ;;  %v1014_v10 = vrot.slane %v1391_v7, 3 }
 0x293   : > { %v994_v11 = vadd.f32 %v993_v9, %v992_v8  ;;  %v1016_v12 = vsel %vm981_vm8, %v1014_v10, 0.0 }
 0x294   : > { %v1017_v13 = vrot.slane %v1016_v12, 4 }
 0x295   : > { %v995_v14 = vrot.slane %v994_v11, 2 }
 0x296   : > { %v1018_v15 = vadd.f32 %v1017_v13, %v1016_v12 }
 0x297   : > { %v996_v16 = vadd.f32 %v995_v14, %v994_v11 }
 0x298   : > { %v1019_v17 = vrot.slane %v1018_v15, 2 }
 0x299   : > { %v997_v18 = vrot.slane %v996_v16, 1 }
 0x29a   : > { %v1020_v19 = vadd.f32 %v1019_v17, %v1018_v15 }
 0x29b   : > { %v998_v20 = vadd.f32 %v997_v18, %v996_v16 }
 0x29c   : > { %v1021_v21 = vrot.slane %v1020_v19, 1 }
 0x29d   : > { %1392 = vlog2.f32 %v998_v20 }
 0x29e   : > { %v1022_v22 = vadd.f32 %v1021_v21, %v1020_v19 }
 0x2a0   : > { %1394 = vlog2.f32 %v1022_v22 }
 0x2a7   : > { %v1393_v23 = vpop.eup %1392 }
 0x2a8   : > { %v1000_v24 = vmul.f32 0.6931472, %v1393_v23 }
 0x2aa   : > { %v1395_v25 = vpop.eup %1394  ;;  %v1001_v26 = vsub.f32 %v989_v2, %v1000_v24 }
 0x2ab   : > { %v1024_v27 = vmul.f32 0.6931472, %v1395_v25 }
 0x2ac   : > { %v1026_v28 = vmul.f32 1.442695, %v1001_v26  ;;  %1039 = vst [vmem:[%s256_s7] sm:$0x2] %v1001_v26 }
 0x2ad   : > { %v1025_v29 = vsub.f32 %v1010_v3, %v1024_v27 }
 0x2ae   : > { %1396 = vpow2.f32 %v1026_v28 }
 0x2af   : > { %v1029_v30 = vmul.f32 1.442695, %v1025_v29  ;;  %1040 = vst [vmem:[%s256_s7 - $0x3] sm:$0x20] %v1025_v29 }
 0x2b1   : > { %1398 = vpow2.f32 %v1029_v30 }
 0x2b8   : > { %v1397_v31 = vpop.eup %1396 }
 0x2b9   : > { %v1028_v33 = vsub.f32 1.0, %v1397_v31 }
 0x2bb   : > { %v1399_v32 = vpop.eup %1398 }
 0x2bc   : > { %v1032_v34 = vrot.slane %v1399_v32, 4 }
 0x2be   : > { %v1034_v35 = vsub.f32 %v1028_v33, %v1032_v34 }
 0x2c0   : > { %v1035_v36 = vmax.f32 %v1034_v35, 1e-30 }
 0x2c2   : > { %1400 = vlog2.f32 %v1035_v36 }
 0x2cc   : > { %v1401_v37 = vpop.eup %1400 }
 0x2cd   : > { %v1037_v38 = vmul.f32 0.6931472, %v1401_v37 }
 0x2cf   : > { %1038 = vst [vmem:[%s256_s7 - $0x1] sm:$0x2] %v1037_v38 }
 0x2d0 PF: > { %s15_s20 = sadd.s32 1, %s1424_s20   ;;  %s1638_s18 = smov %s1420_s19 }
 0x2d1   : > { %p12_p5 = scmp.ge.s32.totalorder %s15_s20, 4   ;;  %s1639_s19 = smov %s1641_s21 }
 0x2d3   :  { %14 = sbr.rel (!%p12_p5) target bundleno = 2 (0x2), region = 74 }

</bundles_post_ra>
